<compile_context>
chip_gen: v5e
topology: v5e:2x2
jax: 0.10.0
libtpu: 0.0.40
codegen_flags: <defaults>
</compile_context>

<pallas_src>
import functools
import numpy as np

import jax
import jax.numpy as jnp
from jax import lax
from jax.experimental import pallas as pl
from jax.experimental.pallas import tpu as pltpu

LANE = 128
M_ALIGN = 16              # bf16 packs 16 rows per sublane group
K_BUCKET = 256            # contraction-dim bucket (bounds #Mosaic compiles, small pad waste)

GROWTH, BN_SIZE, INIT_F = 48, 4, 96          # DenseNet-161
BLOCK_CONFIG = (6, 12, 36, 24)


def _round_up(x, m):
    return ((x + m - 1) // m) * m


def _vmem_limit_bytes():
    # Generation-aware scoped-VMEM limit: v7x has only 64 MiB of VMEM per TensorCore.
    try:
        cap = int(pltpu.get_tpu_info().vmem_capacity_bytes)
    except Exception:
        cap = 64 * 1024 * 1024
    return max(32 * 1024 * 1024, min(cap - 16 * 1024 * 1024, 96 * 1024 * 1024))


_VMEM_LIMIT = _vmem_limit_bytes()
_MM_PARAMS = pltpu.CompilerParams(
    dimension_semantics=("parallel", "parallel"), vmem_limit_bytes=_VMEM_LIMIT)
_EW_PARAMS = pltpu.CompilerParams(
    dimension_semantics=("parallel",), vmem_limit_bytes=_VMEM_LIMIT)


# ------------------------------------------------------------------------------ tiling helpers


def _tile_m(m):
    """(padded M, M tile).  16-aligned padding; small M kept as <=2 tiles (so both v7x cores
    get work), large M uses the 512/256/128 tile that pads least."""
    mp = _round_up(max(m, 1), M_ALIGN)
    if mp <= 512:
        if mp >= 32 and mp % (2 * 8) == 0:
            return mp, mp // 2          # 2 parallel tiles (still a multiple of 8 rows)
        return mp, mp
    best = None
    for t in (512, 256, 128):
        padded = _round_up(mp, t)
        if best is None or padded < best[0]:
            best = (padded, t)
    return best


def _tile_n(np_):
    # Np is either 128 or a multiple of 256 (see make_conv_unit) -> native 256-wide MXU tiles.
    return np_ if np_ <= 256 else 256


# ----------------------------------------------------------------------------- Pallas kernels


def _make_matmul_kernel(has_pre, has_bias, relu):
    """Single-shot MXU matmul (full-K block; weight stays VMEM-resident) with an optional
    fused eval-BN+ReLU prologue and a bias/ReLU epilogue."""

    def kernel(*refs):
        i = 0
        a_ref = refs[i]; i += 1
        if has_pre:
            s_ref, t_ref = refs[i], refs[i + 1]; i += 2
        w_ref = refs[i]; i += 1
        if has_bias:
            b_ref = refs[i]; i += 1
        o_ref = refs[i]

        a = a_ref[...]
        if has_pre:                                   # y = relu(x*scale + shift)
            a = jnp.maximum(a.astype(jnp.float32) * s_ref[...] + t_ref[...], 0.0)
            a = a.astype(jnp.bfloat16)                # bf16 operands into the MXU
        r = jnp.dot(a, w_ref[...], preferred_element_type=jnp.float32)
        if has_bias:
            r = r + b_ref[...]
        if relu:
            r = jnp.maximum(r, 0.0)
        o_ref[...] = r.astype(o_ref.dtype)

    return kernel


def _attention_combine_kernel(sal_ref, att_ref, o_ref):
    # rows (sublanes) = output pixels, lanes = the 3 views/channels
    sal = sal_ref[...]
    att = att_ref[...]
    att = att - jnp.max(att, axis=-1, keepdims=True)            # channel softmax of attention
    e = jnp.exp(att)
    w = e * pl.reciprocal(jnp.sum(e, axis=-1, keepdims=True), approx=True)
    h = jnp.sum(sal * w, axis=-1, keepdims=True)                 # torch.cat(g_i) + sum(dim=1)
    # F.softmax over the size-1 channel dim of the reference is identically 1.0; kept literal.
    eh = jnp.exp(h - jnp.max(h, axis=-1, keepdims=True))
    o_ref[...] = eh / jnp.sum(eh, axis=-1, keepdims=True)


# ------------------------------------------------------------------------- jitted kernel calls


@functools.partial(jax.jit, static_argnames=("relu", "out_dtype"))
def _pallas_matmul(a, w, pre_scale, pre_shift, bias, *, relu, out_dtype):
    """(Mp, Kp) @ (Kp, Np): grid = (M tiles, N tiles), full K per block (no accumulator)."""
    Mp, Kp = a.shape
    _, Np = w.shape
    _, tm = _tile_m(Mp)
    tn = _tile_n(Np)
    assert Mp % tm == 0 and Np % tn == 0
    has_pre = pre_scale is not None
    has_bias = bias is not None

    in_specs = [pl.BlockSpec((tm, Kp), lambda m, n: (m, 0))]
    args = [a]
    if has_pre:
        in_specs.append(pl.BlockSpec((1, Kp), lambda m, n: (0, 0)))
        in_specs.append(pl.BlockSpec((1, Kp), lambda m, n: (0, 0)))
        args += [pre_scale, pre_shift]
    in_specs.append(pl.BlockSpec((Kp, tn), lambda m, n: (0, n)))
    args.append(w)
    if has_bias:
        in_specs.append(pl.BlockSpec((1, tn), lambda m, n: (0, n)))
        args.append(bias)

    return pl.pallas_call(
        _make_matmul_kernel(has_pre, has_bias, relu),
        out_shape=jax.ShapeDtypeStruct((Mp, Np), out_dtype),
        grid=(Mp // tm, Np // tn),
        in_specs=in_specs,
        out_specs=pl.BlockSpec((tm, tn), lambda m, n: (m, n)),
        compiler_params=_MM_PARAMS,
    )(*args)


@jax.jit
def _pallas_attention_combine(sal_hw_v, att_hw_v):
    HW, V = sal_hw_v.shape
    Mp, tm = _tile_m(HW)
    sal = jnp.pad(sal_hw_v, ((0, Mp - HW), (0, 0)))
    att = jnp.pad(att_hw_v, ((0, Mp - HW), (0, 0)))
    out = pl.pallas_call(
        _attention_combine_kernel,
        out_shape=jax.ShapeDtypeStruct((Mp, 1), jnp.float32),
        grid=(Mp // tm,),
        in_specs=[pl.BlockSpec((tm, V), lambda i: (i, 0)),
                  pl.BlockSpec((tm, V), lambda i: (i, 0))],
        out_specs=pl.BlockSpec((tm, 1), lambda i: (i, 0)),
        compiler_params=_EW_PARAMS,
    )(sal, att)
    return out[:HW]


# ------------------------------------------------------------------- parameter ("unit") builders


def _bn_eval_affine(c, eps=1e-5):
    # PyTorch BatchNorm2d init: gamma=1, beta=0, running_mean=0, running_var=1 (eval mode)
    gamma = np.ones(c, np.float32)
    beta = np.zeros(c, np.float32)
    mean = np.zeros(c, np.float32)
    var = np.ones(c, np.float32)
    scale = gamma / np.sqrt(var + eps)
    shift = beta - mean * scale
    return scale, shift


def make_conv_unit(rng, cin, cout, kh, kw, stride, pad, *,
                   pre_bn=None, post_bn=None, bias=False, relu=False,
                   weight=None, bias_val=None):
    """Conv2d(cin, cout, (kh,kw), stride, pad) as a tap-major bf16 (Kp, Np) matmul weight.

    pre_bn : (scale, shift) of an eval BatchNorm(+ReLU) running *before* this conv; fused into
             the matmul prologue (only used for pad==0 convs so PyTorch's pad-after-BN holds).
    post_bn: (scale, shift) of an eval BatchNorm running *after* this conv; folded into the
             weight columns + epilogue bias (exact: the conv has no bias of its own then).
             `relu` applies a ReLU epilogue after the bias.
    """
    assert pre_bn is None or pad == 0
    if weight is None:
        std = np.sqrt(2.0 / (cin * kh * kw))                    # nn.init.kaiming_normal_
        weight = (rng.standard_normal((cout, cin, kh, kw)) * std).astype(np.float32)
    b = bias_val
    if b is None and bias:
        b = (rng.standard_normal(cout) * 0.01).astype(np.float32)
    if post_bn is not None:
        s2, t2 = post_bn
        weight = weight * s2[:, None, None, None]
        b = (b if b is not None else np.zeros(cout, np.float32)) * s2 + t2
    K = cin * kh * kw
    Kp = _round_up(K, K_BUCKET)
    Np = LANE if cout <= LANE else _round_up(cout, 2 * LANE)     # 256-wide MXU tiles
    # tap-major, channel-minor rows: matches the channel-axis concatenate im2col layout
    wt = weight.transpose(2, 3, 1, 0).reshape(K, cout)           # (kh*kw*cin, cout)
    wm = np.zeros((Kp, Np), np.float32)
    wm[:K, :cout] = wt
    unit = dict(w=jnp.asarray(wm, dtype=jnp.bfloat16), cin=cin, cout=cout,
                kh=kh, kw=kw, stride=stride, pad=pad, relu=relu)
    if b is not None:
        bp = np.zeros((1, Np), np.float32)
        bp[0, :cout] = b
        unit['bias'] = jnp.asarray(bp)
    if pre_bn is not None:
        s1, t1 = pre_bn
        sp = np.zeros((1, Kp), np.float32); sp[0, :K] = np.tile(s1, kh * kw)
        tp = np.zeros((1, Kp), np.float32); tp[0, :K] = np.tile(t1, kh * kw)
        unit['pre_scale'] = jnp.asarray(sp)
        unit['pre_shift'] = jnp.asarray(tp)
    return unit


def build_params(seed=0):
    rng = np.random.default_rng(seed)
    p = {}
    # --- DenseNet-161 backbone (growth 48, blocks (6,12,36,24), init 96, bn_size 4) ---
    p['conv0'] = make_conv_unit(rng, 3, INIT_F, 7, 7, 2, 3,
                                post_bn=_bn_eval_affine(INIT_F), relu=True)   # norm0+relu0 folded
    blocks = []
    nf = INIT_F
    for bi, nl in enumerate(BLOCK_CONFIG):
        layers = []
        for li in range(nl):
            cin = nf + li * GROWTH
            # norm1+relu1 as prologue, norm2 folded into the weights, relu2 as epilogue
            c1 = make_conv_unit(rng, cin, BN_SIZE * GROWTH, 1, 1, 1, 0,
                                pre_bn=_bn_eval_affine(cin),
                                post_bn=_bn_eval_affine(BN_SIZE * GROWTH), relu=True)
            c2 = make_conv_unit(rng, BN_SIZE * GROWTH, GROWTH, 3, 3, 1, 1)
            layers.append((c1, c2))
        nf += nl * GROWTH
        trans = None
        if bi != len(BLOCK_CONFIG) - 1:
            trans = make_conv_unit(rng, nf, nf // 2, 1, 1, 1, 0, pre_bn=_bn_eval_affine(nf))
            nf //= 2
        blocks.append((layers, trans))
    p['blocks'] = blocks
    assert nf == 2208
    norm5 = _bn_eval_affine(nf)
    # --- DenseSalBI readout: Conv2d(4416, 1, 1) + bias.  Split (by linearity of the 1x1 conv
    # and of bilinear resize) into two 2208->1 halves applied per scale BEFORE the merge;
    # norm5 + final F.relu of DenseNet fused into each half's prologue. ---
    w_ro = (rng.standard_normal((1, 2 * nf, 1, 1)) * np.sqrt(2.0 / (2 * nf))).astype(np.float32)
    b_ro = (rng.standard_normal(1) * 0.01).astype(np.float32)
    p['readout1'] = make_conv_unit(rng, nf, 1, 1, 1, 1, 0, pre_bn=norm5, bias=True,
                                   weight=w_ro[:, :nf], bias_val=b_ro)
    p['readout2'] = make_conv_unit(rng, nf, 1, 1, 1, 1, 0, pre_bn=norm5,
                                   weight=w_ro[:, nf:])
    # --- Attention stand-in (class undefined in the reference; see module docstring) ---
    p['att1'] = make_conv_unit(rng, 3, 8, 3, 3, 1, 1, bias=True, relu=True)
    p['att2'] = make_conv_unit(rng, 8, 3, 1, 1, 1, 0, bias=True)
    return p


# --------------------------------------------------------------------------------- layer glue


def conv_apply(x, u, out_dtype=jnp.bfloat16):
    """Conv (+ fused prologue BN/ReLU, + bias/ReLU epilogue) on NHWC via one tiled Pallas matmul."""
    V, H, W, C = x.shape
    kh, kw, s, p = u['kh'], u['kw'], u['stride'], u['pad']
    Ho = (H + 2 * p - kh) // s + 1
    Wo = (W + 2 * p - kw) // s + 1
    if kh == 1 and kw == 1 and s == 1 and p == 0:
        a = x.reshape(V * H * W, C)
    else:
        # TODO(synk): a fully in-kernel shifted-tap accumulation would avoid materializing the
        # kh*kw-expanded slab entirely; im2col is kept here but built with a channel-axis
        # concatenate (tap-major weight rows), which avoids the lane-hostile stack+relayout.
        xp = jnp.pad(x, ((0, 0), (p, p), (p, p), (0, 0))) if p else x
        cols = [xp[:, i:i + Ho * s:s, j:j + Wo * s:s, :]
                for i in range(kh) for j in range(kw)]
        a = jnp.concatenate(cols, axis=-1).reshape(V * Ho * Wo, C * kh * kw)
    a = a.astype(jnp.bfloat16)
    M, K = a.shape
    Mp, _ = _tile_m(M)
    Kp = u['w'].shape[0]
    if (Mp, Kp) != (M, K):
        a = jnp.pad(a, ((0, Mp - M), (0, Kp - K)))
    out = _pallas_matmul(a, u['w'], u.get('pre_scale'), u.get('pre_shift'), u.get('bias'),
                         relu=u['relu'], out_dtype=out_dtype)
    return out[:M, :u['cout']].reshape(V, Ho, Wo, u['cout'])


def resize_bilinear(x, out_h, out_w):
    """F.interpolate(mode='bilinear', align_corners=False) on an NHWC tensor (glue, f32)."""
    x = x.astype(jnp.float32)
    N, H, W, C = x.shape

    def src_index(in_size, out_size):
        scale = in_size / out_size
        s = (jnp.arange(out_size, dtype=jnp.float32) + 0.5) * scale - 0.5
        s = jnp.maximum(s, 0.0)
        i0 = jnp.minimum(jnp.floor(s).astype(jnp.int32), in_size - 1)
        frac = s - i0.astype(jnp.float32)
        i1 = jnp.minimum(i0 + 1, in_size - 1)
        return i0, i1, frac

    y0, y1, fy = src_index(H, out_h)
    x0, x1, fx = src_index(W, out_w)
    rows = x[:, y0] * (1.0 - fy)[None, :, None, None] + x[:, y1] * fy[None, :, None, None]
    out = (rows[:, :, x0] * (1.0 - fx)[None, None, :, None]
           + rows[:, :, x1] * fx[None, None, :, None])
    return out


# ------------------------------------------------------------------------------ model forward


def densenet_features(x, p):
    """DenseNet-161 `features` up to (but excluding) norm5; norm5 + final F.relu are fused
    into the readout matmul prologue downstream.  NHWC in/out, bf16 activations."""
    y = conv_apply(x, p['conv0'])                    # conv0 7x7/2 + norm0 (folded) + relu0
    y = lax.reduce_window(                           # pool0: MaxPool2d(3, 2, 1)
        y, jnp.array(-jnp.inf, y.dtype), lax.max,
        (1, 3, 3, 1), (1, 2, 2, 1), ((0, 0), (1, 1), (1, 1), (0, 0)))
    for layers, trans in p['blocks']:
        for c1, c2 in layers:
            z = conv_apply(y, c1)        # norm1+relu1 (prologue) + conv1 1x1 + norm2+relu2 (folded)
            new = conv_apply(z, c2)      # conv2 3x3 pad 1 (zero pad after relu2, like PyTorch)
            y = jnp.concatenate([y, new], axis=-1)   # dense connectivity (torch.cat, dim=1)
        if trans is not None:
            y = conv_apply(y, trans)                 # transition: norm+relu (prologue) + conv 1x1
            V, H, W, C = y.shape
            y = y.astype(jnp.float32).reshape(V, H // 2, 2, W // 2, 2, C).mean(axis=(2, 4))
            y = y.astype(jnp.bfloat16)               # AvgPool2d(2, 2)
    return y                                         # (V, h, w, 2208)


def densesalbi_forward(x, p):
    """DenseSalBI (scale_factor=8): two-scale DenseNet-161, 1x1 readout, x8 bilinear, ReLU."""
    f1 = densenet_features(x, p)                                   # (V, H/32, W/32, 2208)
    x_half = resize_bilinear(x, x.shape[1] // 2, x.shape[2] // 2)  # F.interpolate(x, H/2)
    f2_half = densenet_features(x_half, p)
    # Readout applied per scale BEFORE the merge (exact by linearity): only the 1-channel
    # half-res map is upsampled, never the 2208/4416-channel feature tensors.
    r1 = conv_apply(f1, p['readout1'], out_dtype=jnp.float32)      # norm5+relu prologue + w[:2208] + bias
    r2_half = conv_apply(f2_half, p['readout2'], out_dtype=jnp.float32)  # norm5+relu prologue + w[2208:]
    r2 = resize_bilinear(r2_half, r1.shape[1], r1.shape[2])
    r = r1 + r2                                                    # == Conv2d(4416,1,1)(cat(h1,h2))
    r = resize_bilinear(r, r.shape[1] * 8, r.shape[2] * 8)         # Interpolate(scale=8)
    return jnp.maximum(r, 0.0)                                     # final F.relu, fused by XLA


def densesal_bi3_with_attention(inputs_nchw, params):
    """DenseSalBI3_With_Attention.forward: (V=3 views, 3, H, W) NCHW -> (1, 1, 8H/64, 8W/64)."""
    x = jnp.transpose(inputs_nchw, (0, 2, 3, 1)).astype(jnp.float32)   # NCHW -> NHWC
    V = x.shape[0]
    sal = densesalbi_forward(x, params)                                # (V, Ho, Wo, 1)
    Ho, Wo = sal.shape[1], sal.shape[2]
    # densesal_outputs = torch.cat([out_i], dim=1): NCHW (1,V,Ho,Wo) == NHWC (1,Ho,Wo,V)
    dsal = jnp.transpose(sal[..., 0], (1, 2, 0))[None]                 # (1, Ho, Wo, V)
    # attention net (stand-in): conv3x3 + bias + ReLU (epilogue) -> conv1x1 + bias
    a = conv_apply(dsal, params['att1'])
    a = conv_apply(a, params['att2'], out_dtype=jnp.float32)
    # channel softmax + per-view weighting + sum(dim=1, keepdim) + F.softmax, in one kernel
    out = _pallas_attention_combine(
        dsal.reshape(Ho * Wo, V).astype(jnp.float32), a.reshape(Ho * Wo, V))
    return out.reshape(1, 1, Ho, Wo)                                   # NCHW, like the reference


# ------------------------------------------------------------------------------------- main

if __name__ == "__main__":
    params = build_params(seed=0)
    key = jax.random.PRNGKey(0)
    # 3 views (view_angle_list has 3 entries) of 3x64x64 NCHW images (smallest size that
    # survives the /64 total downsampling of the two-scale DenseNet-161).
    inputs = jax.random.normal(key, (3, 3, 64, 64), dtype=jnp.float32)

    out = densesal_bi3_with_attention(inputs, params)
    out = jax.block_until_ready(out)

    assert out.shape == (1, 1, 16, 16), out.shape
    assert bool(jnp.all(jnp.isfinite(out)))
    print("KERNEL_OK")
</pallas_src>

<mosaic_0001>
module attributes {stable_mosaic.version = 11 : i64} {
  func.func @kernel(%arg0: i32, %arg1: i32, %arg2: memref<512x256xbf16, #tpu.memory_space<vmem>>, %arg3: memref<256x128xbf16, #tpu.memory_space<vmem>>, %arg4: memref<1x128xf32, #tpu.memory_space<vmem>>, %arg5: memref<512x128xbf16, #tpu.memory_space<vmem>>) attributes {dimension_semantics = [#tpu.dimension_semantics<parallel>, #tpu.dimension_semantics<parallel>], iteration_bounds = array<i64: 6, 1>, scalar_prefetch = 0 : i64, scratch_operands = 0 : i64, tpu.core_type = #tpu.core_type<tc>, window_params = [{transform_indices = @transform_0, window_bounds = array<i64: 512, 256>}, {transform_indices = @transform_1, window_bounds = array<i64: 256, 128>}, {transform_indices = @transform_2, window_bounds = array<i64: 1, 128>}, {transform_indices = @transform_3, window_bounds = array<i64: 512, 128>}]} {
    %c0 = arith.constant 0 : index
    %c0_0 = arith.constant 0 : index
    %0 = vector.load %arg2[%c0, %c0_0] : memref<512x256xbf16, #tpu.memory_space<vmem>>, vector<512x256xbf16>
    %c0_1 = arith.constant 0 : index
    %c0_2 = arith.constant 0 : index
    %1 = vector.load %arg3[%c0_1, %c0_2] : memref<256x128xbf16, #tpu.memory_space<vmem>>, vector<256x128xbf16>
    %cst = arith.constant dense<0.000000e+00> : vector<512x128xf32>
    %2 = tpu.matmul %0, %1, %cst {dimension_numbers = #tpu.dot_dimension_numbers<[1], [0], [0], [1], [0, 0, 1, 1], [], []>} : vector<512x256xbf16>, vector<256x128xbf16>, vector<512x128xf32> -> vector<512x128xf32>
    %c0_3 = arith.constant 0 : index
    %c0_4 = arith.constant 0 : index
    %3 = vector.load %arg4[%c0_3, %c0_4] : memref<1x128xf32, #tpu.memory_space<vmem>>, vector<1x128xf32>
    %4 = vector.broadcast %3 : vector<1x128xf32> to vector<512x128xf32>
    %5 = arith.addf %2, %4 : vector<512x128xf32>
    %cst_5 = arith.constant 0.000000e+00 : f32
    %6 = vector.broadcast %cst_5 : f32 to vector<512x128xf32>
    %7 = arith.maximumf %5, %6 : vector<512x128xf32>
    %8 = arith.truncf %7 : vector<512x128xf32> to vector<512x128xbf16>
    %c0_6 = arith.constant 0 : index
    %c0_7 = arith.constant 0 : index
    %9 = vector.load %arg5[%c0_6, %c0_7] : memref<512x128xbf16, #tpu.memory_space<vmem>>, vector<512x128xbf16>
    tpu.vector_store %arg5[%c0_6, %c0_7], %8 {strides = array<i32>} : memref<512x128xbf16, #tpu.memory_space<vmem>>, vector<512x128xbf16>,
    return
  }
  func.func @transform_0(%arg0: i32, %arg1: i32) -> (i32, i32) {
    %c0_i32 = arith.constant 0 : i32
    %c0_i32_0 = arith.constant 0 : i32
    return %arg0, %c0_i32 : i32, i32
  }
  func.func @transform_1(%arg0: i32, %arg1: i32) -> (i32, i32) {
    %c0_i32 = arith.constant 0 : i32
    %c0_i32_0 = arith.constant 0 : i32
    return %c0_i32, %arg1 : i32, i32
  }
  func.func @transform_2(%arg0: i32, %arg1: i32) -> (i32, i32) {
    %c0_i32 = arith.constant 0 : i32
    %c0_i32_0 = arith.constant 0 : i32
    return %c0_i32, %arg1 : i32, i32
  }
  func.func @transform_3(%arg0: i32, %arg1: i32) -> (i32, i32) {
    %c0_i32 = arith.constant 0 : i32
    return %arg0, %arg1 : i32, i32
  }
}

</mosaic_0001>

<bundles_post_ra>
// kernel: _pallas_matmul.1
= control target key start
LH: loop header
LB: loop body
LE: loop exit
PB: predicated region body
PF: predicated region fallthrough
CT: control target
= control target key end

     0   :  { %s2730_s0 = inlined_call_operand.hbm [shape: bf16[3072,256], index: 0, kind: input, shape index: {}]   ;;  %s2731_s1 = inlined_call_operand.hbm [shape: bf16[256,128], index: 1, kind: input, shape index: {}]   ;;  %s2732_s2 = inlined_call_operand.hbm [shape: f32[1,128], index: 2, kind: input, shape index: {}]   ;;  %s2733_s3 = inlined_call_operand.hbm [shape: bf16[3072,128], index: 3, kind: output, shape index: {}]  }
   0x1   :  { %2734 = sst [smem:[#allocation12_spill]] %s2731_s1 }
   0x2   :  { %8 = vsyncpa [#allocation3], 0 }
   0x3   :  { %10 = vsyncpa [#allocation3 + $0x1], 0 }
   0x4   :  { %11 = vsyncpa [#allocation6], 0 }
   0x5   :  { %12 = vsyncpa [#allocation4], 0 }
   0x6   :  { %14 = vsyncpa [#allocation4 + $0x1], 0  ;;  %s2346_s12 = smov 0   ;;  %s2348_s13 = smov 0  }
   0x7   :  { %s2350_s14 = smov 0   ;;  %s2352_s15 = smov 0  }
   0x8   :  { %s2354_s16 = smov 0   ;;  %s2356_s17 = smov 0  }
   0x9 LB: > { %s1420_s18 = sadd.s32 4294967295, %s2316_s17   ;;  %s1421_s19 = sadd.s32 4294967294, %s2316_s17   ;;  %s2316_s17 = sphi %s2356_s17, %s20_s17   ;;  %s2312_s16 = sphi %s2354_s16, %s2747_s16   ;;  %s2308_s15 = sphi %s2352_s15, %s2746_s15   ;;  %s2304_s14 = sphi %s2350_s14, %s2745_s14   ;;  %s2300_s13 = sphi %s2348_s13, %s2744_s13   ;;  %s2296_s12 = sphi %s2346_s12, %s2743_s12  }
   0xa   : > { %p52_p0 = scmp.ne.s32.totalorder %s2300_s13, %s2296_s12  ;;  %p2380_p1 = scmp.eq.s32.totalorder %s1420_s18, 0 }
   0xb   : > { %p2384_p2 = scmp.eq.s32.totalorder %s1420_s18, 5  ;;  %p136_p3 = scmp.eq.s32.totalorder %s1421_s19, 5 }
   0xc   : > { %p2390_p4 = por %p2380_p1, %p52_p0  ;;  %p1422_p5 = scmp.ge.s32.totalorder %s2316_s17, 1 }
   0xd   : > { %p2395_p6 = por %p136_p3, %p52_p0  ;;  %p143_p7 = scmp.lt.s32.totalorder %s2316_s17, 7 }
   0xe   : > { %s2739_s1 = sld [smem:[#allocation12_spill]]  ;;  %s2318_s28 = smov [#allocation5]  }
   0xf   : > { %p2403_p8 = pnand %p1422_p5, %p143_p7  ;;  %s158_s29 = sshll.u32 %s2318_s28, 4  ;;  %s159_s29 = int_to_ptr.vmem [resolvable:$true] %s158_s29 }
  0x10   : > { %s172_s5 = sshll.u32 %s2732_s2, 4  ;;  %s2319_s6 = smov 64   ;;  %s173_s5 = int_to_ptr.hbm [resolvable:$true] %s172_s5 }
  0x11   : > { %p2062_p9 = pneg %p2403_p8  ;;  %s2320_s7 = smov 4  }
  0x12   : > { %s2321_s8 = smov [#allocation7]   ;;  %s32_s10 = sadd.s32 1, %s2312_s16 }
  0x13   : > { %p2063_p10 = pnand %p2062_p9, %p2380_p1  ;;  %s174_s9 = sshll.u32 %s2321_s8, 4  ;;  %s175_s9 = int_to_ptr.vmem [resolvable:$true] %s174_s9 }
  0x14   : > { %s156_s26 = sshll.u32 %s2739_s1, 4  ;;  %s39_s11 = sadd.s32 1, %s2304_s14  ;;  %s157_s26 = int_to_ptr.hbm [resolvable:$true] %s156_s26 }
  0x15   : > { %2065 = dma.hbm_to_vmem [thread:$0]  (!%p2063_p10), %s157_s26, 2048, %s159_s29, [#allocation6], %s2319_s6, %s2319_s6, %s2320_s7  }
  0x16   : > { %2068 = dma.hbm_to_vmem [thread:$0]  (!%p2063_p10), %s173_s5, 16, %s175_s9, [#allocation6]  }
  0x17   : > { %p34_p11 = scmp.ge.s32.totalorder %s32_s10, 6  ;;  %p46_p12 = scmp.ne.s32.totalorder %s2304_s14, %s2300_s13 }
  0x18   : > { %p47_p13 = scmp.eq.s32.totalorder %s2316_s17, 0  ;;  %p2079_p0 = scmp.lt.s32.totalorder %s2316_s17, 6 }
  0x19   : > { %s2749_s10 = smov (%p34_p11, %s32_s10), 0  ;;  %p2428_p5 = por %p2384_p2, %p46_p12 }
  0x1a   : > { %p2422_p3 = por %p47_p13, %p46_p12  ;;  %s36_s24 = ssub.s32 %s2312_s16, %s2749_s10 }
  0x1b   : > { %s185_s25 = sand.u32 1, %s2304_s14   ;;  %p37_p7 = scmp.eq.s32.totalorder %s36_s24, 0 }
  0x1c   : > { %s1426_s26 = sshll.u32 %s185_s25, 9  ;;  %s1761_s28 = sshll.u32 %s2312_s16, 9 }
  0x1d   : > { %s2437_s29 = scalar_select %p37_p7, %s2304_s14, %s39_s11  }
  0x1e   : > { %s195_s5 = scalar_lea.hbm %s2730_s0, %s1761_s28  ;;  %s189_s7 = scalar_lea.vmem [#allocation2], %s1426_s26 }
  0x1f   : > { %s196_s6 = sshll.u32 %s195_s5, 4  ;;  %s198_s8 = sshll.u32 %s189_s7, 4  ;;  %s197_s6 = int_to_ptr.hbm [resolvable:$true] %s196_s6  ;;  %s199_s8 = int_to_ptr.vmem [resolvable:$true] %s198_s8 }
  0x20   : > { %p2070_p2 = pnand %p2079_p0, %p2422_p3  ;;  %s186_s21 = scalar_lea.sflag [#allocation3], %s185_s25 }
  0x21   : > { %s2322_s9 = smov 128   ;;  %s2323_s1 = smov 8  }
  0x22   : > { %2072 = dma.hbm_to_vmem [thread:$0]  (!%p2070_p2), %s197_s6, 8192, %s199_s8, %s186_s21, %s2322_s9, %s2322_s9, %s2323_s1  }
  0x23   : > { %210 = sbr.rel (%p2403_p8) target bundleno = 467 (0x1d3), region = 32  ;;  %s2449_s11 = sand.u32 (!%p2403_p8), 1, %s2300_s13  }
  0x24   : > { %s1431_s24 = sshll.u32 (!%p2403_p8), %s2449_s11, 9  ;;  %s213_s26 = scalar_lea.sflag (!%p2403_p8), [#allocation3], %s2449_s11 }
  0x25   : > { %s2453_s28 = scalar_lea.vmem (!%p2403_p8), [#allocation2], %s1431_s24 }
  0x28   : > { %2283 = dma.done.wait (%p2390_p4), %s213_s26, 8192  }
  0x29   : > { %2285 = vsyncadd (%p2390_p4), %s213_s26, 4294959104 }
  0x2a   : > { %2287 = dma.done.wait (%p2380_p1), [#allocation6], 2064  }
  0x2b   : > { %2289 = vsyncadd (%p2380_p1), [#allocation6], 4294965232  ;;  %v1833_v0 = vld [vmem:[#allocation5 + $0x38] sm:$0xff]  ;;  %v1832_v2 = vld [vmem:[#allocation5 + $0x30] sm:$0xff]  ;;  %s1434_s1 = sshll.u32 %s2449_s11, 8  ;;  %s1842_s22 = sshll.u32 %s2308_s15, 8 }
  0x2c   : > { %v1841_v1 = vld [vmem:[#allocation5 + $0x78] sm:$0xff]  ;;  %768 = vmatpush.bf16.msra.mxu0 %v1833_v0  ;;  %2034 = vmatpush.bf16.msra.mxu2 %v1833_v0  ;;  %v1840_v3 = vld [vmem:[#allocation5 + $0x70] sm:$0xff]  ;;  %v1831_v4 = vld [vmem:[#allocation5 + $0x28] sm:$0xff]  ;;  %s2550_s20 = scalar_lea.vmem [#allocation8], %s1434_s1  ;;  %s1311_s25 = scalar_lea.hbm %s2733_s3, %s1842_s22 }
  0x2d   : > { %937 = vmatpush.bf16.msra.mxu1 %v1841_v1  ;;  %2042 = vmatpush.bf16.msra.mxu3 %v1841_v1  ;;  %v1839_v5 = vld [vmem:[#allocation5 + $0x68] sm:$0xff]  ;;  %v1830_v6 = vld [vmem:[#allocation5 + $0x20] sm:$0xff]  ;;  %v1829_v8 = vld [vmem:[#allocation5 + $0x18] sm:$0xff]  ;;  %s1312_s30 = sshll.u32 %s2550_s20, 4  ;;  %s1314_s4 = sshll.u32 %s1311_s25, 4  ;;  %s1313_s30 = int_to_ptr.vmem [resolvable:$true] %s1312_s30  ;;  %s1315_s4 = int_to_ptr.hbm [resolvable:$true] %s1314_s4 }
  0x2e   : > { %v1838_v7 = vld [vmem:[#allocation5 + $0x60] sm:$0xff]  ;;  %v1837_v9 = vld [vmem:[#allocation5 + $0x58] sm:$0xff]  ;;  %v1828_v10 = vld [vmem:[#allocation5 + $0x10] sm:$0xff]  ;;  %s1299_s15 = scalar_lea.sflag [#allocation4], %s2449_s11  ;;  %s2244_s5 = sshra.s32 %s1315_s4, 4  ;;  %s2245_s5 = int_to_ptr.hbm [resolvable:$true] %s2244_s5 }
  0x2f   : > { %v1836_v11 = vld [vmem:[#allocation5 + $0x50] sm:$0xff]  ;;  %v1827_v12 = vld [vmem:[#allocation5 + $0x8] sm:$0xff]  ;;  %v1826_v14 = vld [vmem:[#allocation5] sm:$0xff]  ;;  %s2246_s6 = scalar_lea.hbm %s2245_s5, 256  ;;  %s2250_s21 = scalar_lea.hbm %s2733_s3, 1536 }
  0x30   : > { %769 = vmatpush.bf16.msra.mxu0 %v1832_v2  ;;  %2035 = vmatpush.bf16.msra.mxu2 %v1832_v2  ;;  %v1835_v13 = vld [vmem:[#allocation5 + $0x48] sm:$0xff]  ;;  %v1834_v15 = vld [vmem:[#allocation5 + $0x40] sm:$0xff]  ;;  %v1445_v28 = vld [vmem:[%s2453_s28 + $0x10] sm:$0xf]  ;;  %p2247_p1 = scmp.ne.s32.totalorder %s2245_s5, %s2246_s6  ;;  %p2251_p9 = scmp.lt.s32.totalorder %s2245_s5, %s2733_s3 }
  0x31   : > { %938 = vmatpush.bf16.msra.mxu1 %v1840_v3  ;;  %2043 = vmatpush.bf16.msra.mxu3 %v1840_v3  ;;  %v1437_v16 = vld [vmem:[%s2453_s28] sm:$0xf]  ;;  %v1763_v17 = vld [vmem:[%s2453_s28 + $0x4] sm:$0xf0]  ;;  %v1762_v20 = vld [vmem:[%s2453_s28 + $0x4] sm:$0xf]  ;;  %p2252_p10 = scmp.lt.s32.totalorder %s2250_s21, %s2246_s6 }
  0x32   : > { %v1565_v18 = vld [vmem:[%s2453_s28 + $0x100] sm:$0xf]  ;;  %v1795_v19 = vld [vmem:[%s2453_s28 + $0x104] sm:$0xf0]  ;;  %v1439_v21 = vld [vmem:[%s2453_s28 + $0x8] sm:$0xf0]  ;;  %v1438_v24 = vor.u32 %v1763_v17, %v1437_v16  ;;  %p2248_p4 = pnand %p2247_p1, %p2428_p5 }
  0x33   : > { %v1794_v22 = vld [vmem:[%s2453_s28 + $0x104] sm:$0xf]  ;;  %v1567_v23 = vld [vmem:[%s2453_s28 + $0x108] sm:$0xf0]  ;;  %v1566_v25 = vor.u32 %v1795_v19, %v1565_v18  ;;  %v1442_v26 = vor.u32 %v1762_v20, %v1439_v21  ;;  %v1765_v29 = vld [vmem:[%s2453_s28 + $0x14] sm:$0xf0]  ;;  %p2253_p11 = por %p2252_p10, %p2251_p9 }
  0x34   : > { %770 = vmatpush.bf16.msra.mxu0 %v1831_v4  ;;  %2036 = vmatpush.bf16.msra.mxu2 %v1831_v4  ;;  %v1570_v27 = vor.u32 %v1794_v22, %v1567_v23  ;;  %v1573_v30 = vld [vmem:[%s2453_s28 + $0x110] sm:$0xf]  ;;  %v1797_v31 = vld [vmem:[%s2453_s28 + $0x114] sm:$0xf0]  ;;  %v1764_v32 = vld [vmem:[%s2453_s28 + $0x14] sm:$0xf]  ;;  %v1446_v36 = vor.u32 %v1765_v29, %v1445_v28  ;;  %p2249_p8 = pneg %p2248_p4 }
  0x35   : > { %939 = vmatpush.bf16.msra.mxu1 %v1839_v5  ;;  %2044 = vmatpush.bf16.msra.mxu3 %v1839_v5  ;;  %v1447_v33 = vld [vmem:[%s2453_s28 + $0x18] sm:$0xf0]  ;;  %v1796_v34 = vld [vmem:[%s2453_s28 + $0x114] sm:$0xf]  ;;  %v1574_v37 = vor.u32 %v1797_v31, %v1573_v30  ;;  %v1453_v40 = vld [vmem:[%s2453_s28 + $0x20] sm:$0xf] }
  0x36   : > { %v1575_v35 = vld [vmem:[%s2453_s28 + $0x118] sm:$0xf0]  ;;  %v1450_v38 = vor.u32 %v1764_v32, %v1447_v33  ;;  %v1767_v41 = vld [vmem:[%s2453_s28 + $0x24] sm:$0xf0]  ;;  %v1581_v42 = vld [vmem:[%s2453_s28 + $0x120] sm:$0xf]  ;;  %p2254_p12 = pnand %p2253_p11, %p2249_p8 }
  0x37   : > { %v1578_v39 = vor.u32 %v1796_v34, %v1575_v35  ;;  %v1799_v43 = vld [vmem:[%s2453_s28 + $0x124] sm:$0xf0]  ;;  %v1766_v44 = vld [vmem:[%s2453_s28 + $0x24] sm:$0xf]  ;;  %v1455_v45 = vld [vmem:[%s2453_s28 + $0x28] sm:$0xf0]  ;;  %v1454_v48 = vor.u32 %v1767_v41, %v1453_v40 }
  0x38   : > { %771 = vmatpush.bf16.msra.mxu0 %v1830_v6  ;;  %2037 = vmatpush.bf16.msra.mxu2 %v1830_v6  ;;  %v1798_v46 = vld [vmem:[%s2453_s28 + $0x124] sm:$0xf]  ;;  %v1583_v47 = vld [vmem:[%s2453_s28 + $0x128] sm:$0xf0]  ;;  %v1582_v49 = vor.u32 %v1799_v43, %v1581_v42  ;;  %v1458_v50 = vor.u32 %v1766_v44, %v1455_v45  ;;  %v1461_v52 = vld [vmem:[%s2453_s28 + $0x30] sm:$0xf] }
  0x39   : > { %940 = vmatpush.bf16.msra.mxu1 %v1838_v7  ;;  %2045 = vmatpush.bf16.msra.mxu3 %v1838_v7  ;;  %v1586_v51 = vor.u32 %v1798_v46, %v1583_v47  ;;  %v1769_v53 = vld [vmem:[%s2453_s28 + $0x34] sm:$0xf0]  ;;  %v1589_v54 = vld [vmem:[%s2453_s28 + $0x130] sm:$0xf]  ;;  %v1768_v56 = vld [vmem:[%s2453_s28 + $0x34] sm:$0xf] }
  0x3a   : > { %v1801_v55 = vld [vmem:[%s2453_s28 + $0x134] sm:$0xf0]  ;;  %v1463_v57 = vld [vmem:[%s2453_s28 + $0x38] sm:$0xf0]  ;;  %v1800_v58 = vld [vmem:[%s2453_s28 + $0x134] sm:$0xf]  ;;  %v1462_v60 = vor.u32 %v1769_v53, %v1461_v52 }
  0x3b   : > { %v1591_v59 = vld [vmem:[%s2453_s28 + $0x138] sm:$0xf0]  ;;  %v1590_v61 = vor.u32 %v1801_v55, %v1589_v54  ;;  %v1466_v62 = vor.u32 %v1768_v56, %v1463_v57  ;;  %v1469_v0 = vld [vmem:[%s2453_s28 + $0x40] sm:$0xf]  ;;  %v1771_v1 = vld [vmem:[%s2453_s28 + $0x44] sm:$0xf0] }
  0x3c   : > { %772 = vmatpush.bf16.msra.mxu0 %v1829_v8  ;;  %2038 = vmatpush.bf16.msra.mxu2 %v1829_v8  ;;  %v1594_v63 = vor.u32 %v1800_v58, %v1591_v59  ;;  %v1597_v2 = vld [vmem:[%s2453_s28 + $0x140] sm:$0xf]  ;;  %v1803_v3 = vld [vmem:[%s2453_s28 + $0x144] sm:$0xf0]  ;;  %v1770_v4 = vld [vmem:[%s2453_s28 + $0x44] sm:$0xf]  ;;  %v1470_v8 = vor.u32 %v1771_v1, %v1469_v0 }
  0x3d   : > { %941 = vmatpush.bf16.msra.mxu1 %v1837_v9  ;;  %2046 = vmatpush.bf16.msra.mxu3 %v1837_v9  ;;  %v1471_v5 = vld [vmem:[%s2453_s28 + $0x48] sm:$0xf0]  ;;  %v1802_v6 = vld [vmem:[%s2453_s28 + $0x144] sm:$0xf]  ;;  %v1598_v9 = vor.u32 %v1803_v3, %v1597_v2  ;;  %v1772_v16 = vld [vmem:[%s2453_s28 + $0x54] sm:$0xf] }
  0x3e   : > { %v1599_v7 = vld [vmem:[%s2453_s28 + $0x148] sm:$0xf0]  ;;  %v1479_v17 = vld [vmem:[%s2453_s28 + $0x58] sm:$0xf0]  ;;  %v1804_v18 = vld [vmem:[%s2453_s28 + $0x154] sm:$0xf] }
  0x3f   : > { %v1607_v19 = vld [vmem:[%s2453_s28 + $0x158] sm:$0xf0]  ;;  %v1482_v22 = vor.u32 %v1772_v16, %v1479_v17  ;;  %v1774_v28 = vld [vmem:[%s2453_s28 + $0x64] sm:$0xf]  ;;  %v1487_v29 = vld [vmem:[%s2453_s28 + $0x68] sm:$0xf0] }
  0x40   : > { %773 = vmatpush.bf16.msra.mxu0 %v1828_v10  ;;  %2039 = vmatpush.bf16.msra.mxu2 %v1828_v10  ;;  %v1474_v10 = vor.u32 %v1770_v4, %v1471_v5  ;;  %v1610_v23 = vor.u32 %v1804_v18, %v1607_v19  ;;  %v1806_v30 = vld [vmem:[%s2453_s28 + $0x164] sm:$0xf]  ;;  %v1615_v31 = vld [vmem:[%s2453_s28 + $0x168] sm:$0xf0]  ;;  %v1490_v34 = vor.u32 %v1774_v28, %v1487_v29  ;;  %v1776_v40 = vld [vmem:[%s2453_s28 + $0x74] sm:$0xf] }
  0x41   : > { %942 = vmatpush.bf16.msra.mxu1 %v1836_v11  ;;  %2047 = vmatpush.bf16.msra.mxu3 %v1836_v11  ;;  %v1602_v11 = vor.u32 %v1802_v6, %v1599_v7  ;;  %v1618_v35 = vor.u32 %v1806_v30, %v1615_v31  ;;  %v1495_v41 = vld [vmem:[%s2453_s28 + $0x78] sm:$0xf0]  ;;  %v1808_v42 = vld [vmem:[%s2453_s28 + $0x174] sm:$0xf]  ;;  %v1778_v52 = vld [vmem:[%s2453_s28 + $0x84] sm:$0xf] }
  0x42   : > { %v1623_v43 = vld [vmem:[%s2453_s28 + $0x178] sm:$0xf0]  ;;  %v1498_v46 = vor.u32 %v1776_v40, %v1495_v41  ;;  %v1503_v53 = vld [vmem:[%s2453_s28 + $0x88] sm:$0xf0]  ;;  %v1810_v54 = vld [vmem:[%s2453_s28 + $0x184] sm:$0xf] }
  0x43   : > { %v1626_v47 = vor.u32 %v1808_v42, %v1623_v43  ;;  %v1631_v55 = vld [vmem:[%s2453_s28 + $0x188] sm:$0xf0]  ;;  %v1506_v59 = vor.u32 %v1778_v52, %v1503_v53  ;;  %v1812_v16 = vld [vmem:[%s2453_s28 + $0x194] sm:$0xf]  ;;  %v1639_v17 = vld [vmem:[%s2453_s28 + $0x198] sm:$0xf0] }
  0x44   : > { %774 = vmatpush.bf16.msra.mxu0 %v1827_v12  ;;  %2040 = vmatpush.bf16.msra.mxu2 %v1827_v12  ;;  %v1477_v12 = vld [vmem:[%s2453_s28 + $0x50] sm:$0xf]  ;;  %v1517_v42 = vld [vmem:[%s2453_s28 + $0xa0] sm:$0xf]  ;;  %v1783_v43 = vld [vmem:[%s2453_s28 + $0xa4] sm:$0xf0] }
  0x45   : > { %943 = vmatpush.bf16.msra.mxu1 %v1835_v13  ;;  %2048 = vmatpush.bf16.msra.mxu3 %v1835_v13  ;;  %v1773_v13 = vld [vmem:[%s2453_s28 + $0x54] sm:$0xf0]  ;;  %v1518_v53 = vor.u32 %v1783_v43, %v1517_v42 }
  0x46   : > { %v1478_v20 = vor.u32 %v1773_v13, %v1477_v12  ;;  %v1780_v12 = vld [vmem:[%s2453_s28 + $0x94] sm:$0xf]  ;;  %v1511_v13 = vld [vmem:[%s2453_s28 + $0x98] sm:$0xf0] }
  0x48   : > { %775 = vmatpush.bf16.msra.mxu0 %v1826_v14  ;;  %2041 = vmatpush.bf16.msra.mxu2 %v1826_v14  ;;  %v1605_v14 = vld [vmem:[%s2453_s28 + $0x150] sm:$0xf] }
  0x49   : > { %944 = vmatpush.bf16.msra.mxu1 %v1834_v15  ;;  %2049 = vmatpush.bf16.msra.mxu3 %v1834_v15  ;;  %v1805_v15 = vld [vmem:[%s2453_s28 + $0x154] sm:$0xf0] }
  0x4a   : > { %v1606_v21 = vor.u32 %v1805_v15, %v1605_v14 }
  0x4b   : > { %776 = vmatmul.bf16.vlgmr.msra.gmra.mxu0 %v1438_v24  ;;  %856 = vmatmul.bf16.vlgmr.msra.gmra.mxu2 %v1566_v25  ;;  %v1485_v24 = vld [vmem:[%s2453_s28 + $0x60] sm:$0xf]  ;;  %v1775_v25 = vld [vmem:[%s2453_s28 + $0x64] sm:$0xf0] }
  0x4c   : > { %945 = vmatmul.bf16.vlgmr.msra.gmra.mxu1 %v1442_v26  ;;  %1025 = vmatmul.bf16.vlgmr.msra.gmra.mxu3 %v1570_v27  ;;  %v1613_v26 = vld [vmem:[%s2453_s28 + $0x160] sm:$0xf]  ;;  %v1807_v27 = vld [vmem:[%s2453_s28 + $0x164] sm:$0xf0]  ;;  %v1486_v32 = vor.u32 %v1775_v25, %v1485_v24 }
  0x4d   : > { %v1614_v33 = vor.u32 %v1807_v27, %v1613_v26  ;;  %v1514_v26 = vor.u32 %v1780_v12, %v1511_v13  ;;  %v1642_v27 = vor.u32 %v1812_v16, %v1639_v17  ;;  %v1525_v13 = vld [vmem:[%s2453_s28 + $0xb0] sm:$0xf]  ;;  %v1817_v16 = vld [vmem:[%s2453_s28 + $0x1b4] sm:$0xf0]  ;;  %v1784_v17 = vld [vmem:[%s2453_s28 + $0xb4] sm:$0xf] }
  0x5b   : > { %781 = vmatmul.bf16.gmra.mxu0 %v1446_v36  ;;  %861 = vmatmul.bf16.gmra.mxu2 %v1574_v37  ;;  %v1493_v36 = vld [vmem:[%s2453_s28 + $0x70] sm:$0xf]  ;;  %v1777_v37 = vld [vmem:[%s2453_s28 + $0x74] sm:$0xf0] }
  0x5c   : > { %950 = vmatmul.bf16.gmra.mxu1 %v1450_v38  ;;  %1030 = vmatmul.bf16.gmra.mxu3 %v1578_v39  ;;  %v1621_v38 = vld [vmem:[%s2453_s28 + $0x170] sm:$0xf]  ;;  %v1809_v39 = vld [vmem:[%s2453_s28 + $0x174] sm:$0xf0]  ;;  %v1494_v44 = vor.u32 %v1777_v37, %v1493_v36 }
  0x5d   : > { %v1622_v45 = vor.u32 %v1809_v39, %v1621_v38 }
  0x6b   : > { %786 = vmatmul.bf16.gmra.mxu0 %v1454_v48  ;;  %866 = vmatmul.bf16.gmra.mxu2 %v1582_v49  ;;  %v1501_v48 = vld [vmem:[%s2453_s28 + $0x80] sm:$0xf]  ;;  %v1779_v49 = vld [vmem:[%s2453_s28 + $0x84] sm:$0xf0] }
  0x6c   : > { %955 = vmatmul.bf16.gmra.mxu1 %v1458_v50  ;;  %1035 = vmatmul.bf16.gmra.mxu3 %v1586_v51  ;;  %v1629_v50 = vld [vmem:[%s2453_s28 + $0x180] sm:$0xf]  ;;  %v1811_v51 = vld [vmem:[%s2453_s28 + $0x184] sm:$0xf0]  ;;  %v1502_v56 = vor.u32 %v1779_v49, %v1501_v48 }
  0x6d   : > { %v1630_v57 = vor.u32 %v1811_v51, %v1629_v50  ;;  %v1814_v50 = vld [vmem:[%s2453_s28 + $0x1a4] sm:$0xf]  ;;  %v1647_v51 = vld [vmem:[%s2453_s28 + $0x1a8] sm:$0xf0] }
  0x7b   : > { %791 = vmatmul.bf16.gmra.mxu0 %v1462_v60  ;;  %871 = vmatmul.bf16.gmra.mxu2 %v1590_v61  ;;  %v1634_v60 = vor.u32 %v1810_v54, %v1631_v55  ;;  %v2535_v61 = vld [vmem:[#allocation7] ss:$0 sm:$0xff] }
  0x7c   : > { %960 = vmatmul.bf16.gmra.mxu1 %v1466_v62  ;;  %1040 = vmatmul.bf16.gmra.mxu3 %v1594_v63 }
  0x8b   : > { %796 = vmatmul.bf16.gmra.mxu0 %v1470_v8  ;;  %876 = vmatmul.bf16.gmra.mxu2 %v1598_v9  ;;  %v1509_v8 = vld [vmem:[%s2453_s28 + $0x90] sm:$0xf]  ;;  %v1781_v9 = vld [vmem:[%s2453_s28 + $0x94] sm:$0xf0] }
  0x8c   : > { %965 = vmatmul.bf16.gmra.mxu1 %v1474_v10  ;;  %1045 = vmatmul.bf16.gmra.mxu3 %v1602_v11  ;;  %v1637_v10 = vld [vmem:[%s2453_s28 + $0x190] sm:$0xf]  ;;  %v1813_v11 = vld [vmem:[%s2453_s28 + $0x194] sm:$0xf0]  ;;  %v1510_v19 = vor.u32 %v1781_v9, %v1509_v8 }
  0x8d   : > { %v1638_v24 = vor.u32 %v1813_v11, %v1637_v10 }
  0x9b   : > { %801 = vmatmul.bf16.gmra.mxu0 %v1478_v20  ;;  %881 = vmatmul.bf16.gmra.mxu2 %v1606_v21 }
  0x9c   : > { %970 = vmatmul.bf16.gmra.mxu1 %v1482_v22  ;;  %1050 = vmatmul.bf16.gmra.mxu3 %v1610_v23 }
  0xab   : > { %806 = vmatmul.bf16.gmra.mxu0 %v1486_v32  ;;  %886 = vmatmul.bf16.gmra.mxu2 %v1614_v33 }
  0xac   : > { %975 = vmatmul.bf16.gmra.mxu1 %v1490_v34  ;;  %1055 = vmatmul.bf16.gmra.mxu3 %v1618_v35 }
  0xbb   : > { %811 = vmatmul.bf16.gmra.mxu0 %v1494_v44  ;;  %891 = vmatmul.bf16.gmra.mxu2 %v1622_v45  ;;  %v1645_v44 = vld [vmem:[%s2453_s28 + $0x1a0] sm:$0xf]  ;;  %v1815_v45 = vld [vmem:[%s2453_s28 + $0x1a4] sm:$0xf0] }
  0xbc   : > { %980 = vmatmul.bf16.gmra.mxu1 %v1498_v46  ;;  %1060 = vmatmul.bf16.gmra.mxu3 %v1626_v47  ;;  %v1782_v46 = vld [vmem:[%s2453_s28 + $0xa4] sm:$0xf]  ;;  %v1519_v47 = vld [vmem:[%s2453_s28 + $0xa8] sm:$0xf0] }
  0xc8   : > { %v777_v58 = vpop.f32.mrf.mxu0 }
  0xc9   : > { %v946_v62 = vpop.f32.mrf.mxu1  ;;  %v778_v63 = vadd.f32 %v2535_v61, %v777_v58  ;;  %v1646_v58 = vor.u32 %v1815_v45, %v1645_v44 }
  0xcb   : > { %816 = vmatmul.bf16.gmra.mxu0 %v1502_v56  ;;  %896 = vmatmul.bf16.gmra.mxu2 %v1630_v57  ;;  %v947_v3 = vadd.f32 %v946_v62, %v778_v63  ;;  %v1650_v62 = vor.u32 %v1814_v50, %v1647_v51  ;;  %v1819_v50 = vld [vmem:[%s2453_s28 + $0x1c4] sm:$0xf0]  ;;  %v1786_v51 = vld [vmem:[%s2453_s28 + $0xc4] sm:$0xf] }
  0xcc   : > { %985 = vmatmul.bf16.gmra.mxu1 %v1506_v59  ;;  %1065 = vmatmul.bf16.gmra.mxu3 %v1634_v60  ;;  %v1522_v60 = vor.u32 %v1782_v46, %v1519_v47  ;;  %v1533_v47 = vld [vmem:[%s2453_s28 + $0xc0] sm:$0xf] }
  0xcd   : > { %v1106_v14 = vmax.f32 %v947_v3, 0.0 }
  0xce   : > { %v857_v0 = vpop.f32.mrf.mxu2 }
  0xcf   : > { %v1026_v1 = vpop.f32.mrf.mxu3  ;;  %v858_v6 = vadd.f32 %v2535_v61, %v857_v0 }
  0xd0   : > { %v779_v2 = vpop.f32.mrf.mxu0 }
  0xd1   : > { %v780_v4 = vadd.f32 %v2535_v61, %v779_v2  ;;  %v948_v5 = vpop.f32.mrf.mxu1  ;;  %v1027_v20 = vadd.f32 %v1026_v1, %v858_v6 }
  0xd3   : > { %v949_v7 = vadd.f32 %v948_v5, %v780_v4  ;;  %v1138_v30 = vmax.f32 %v1027_v20, 0.0 }
  0xd5   : > { %v1107_v15 = vmax.f32 %v949_v7, 0.0 }
  0xd6   : > { %v859_v18 = vpop.f32.mrf.mxu2 }
  0xd7   : > { %v1846_v21 = vpack.c.bf16 %v1107_v15, %v1106_v14  ;;  %v860_v22 = vadd.f32 %v2535_v61, %v859_v18  ;;  %v1028_v23 = vpop.f32.mrf.mxu3  ;;  %v1785_v14 = vld [vmem:[%s2453_s28 + $0xb4] sm:$0xf0]  ;;  %v1653_v15 = vld [vmem:[%s2453_s28 + $0x1b0] sm:$0xf]  ;;  %v1527_v18 = vld [vmem:[%s2453_s28 + $0xb8] sm:$0xf0] }
  0xd8   : > { %v782_v25 = vpop.f32.mrf.mxu0 }
  0xd9   : > { %1847 = vst [vmem:[%s2550_s20] sm:$0xff] %v1846_v21   ;;  %v1029_v28 = vadd.f32 %v1028_v23, %v860_v22  ;;  %v951_v29 = vpop.f32.mrf.mxu1  ;;  %v783_v33 = vadd.f32 %v2535_v61, %v782_v25  ;;  %v1816_v21 = vld [vmem:[%s2453_s28 + $0x1b4] sm:$0xf]  ;;  %v1655_v22 = vld [vmem:[%s2453_s28 + $0x1b8] sm:$0xf0] }
  0xdb   : > { %v1139_v31 = vmax.f32 %v1029_v28, 0.0  ;;  %821 = vmatmul.bf16.gmra.mxu0 %v1510_v19  ;;  %901 = vmatmul.bf16.gmra.mxu2 %v1638_v24  ;;  %v952_v37 = vadd.f32 %v951_v29, %v783_v33  ;;  %v1526_v24 = vor.u32 %v1785_v14, %v1525_v13  ;;  %v1654_v29 = vor.u32 %v1817_v16, %v1653_v15 }
  0xdc   : > { %990 = vmatmul.bf16.gmra.mxu1 %v1514_v26  ;;  %1070 = vmatmul.bf16.gmra.mxu3 %v1642_v27 }
  0xdd   : > { %v1926_v32 = vpack.c.bf16 %v1139_v31, %v1138_v30  ;;  %v1108_v48 = vmax.f32 %v952_v37, 0.0  ;;  %v1530_v31 = vor.u32 %v1784_v17, %v1527_v18  ;;  %v1541_v18 = vld [vmem:[%s2453_s28 + $0xd0] sm:$0xf] }
  0xde   : > { %v862_v34 = vpop.f32.mrf.mxu2 }
  0xdf   : > { %2018 = vst [vmem:[%s2550_s20 + $0x80] sm:$0xff] %v1926_v32   ;;  %v1031_v35 = vpop.f32.mrf.mxu3  ;;  %v863_v40 = vadd.f32 %v2535_v61, %v862_v34  ;;  %v1658_v32 = vor.u32 %v1816_v21, %v1655_v22  ;;  %v1821_v21 = vld [vmem:[%s2453_s28 + $0x1d4] sm:$0xf0]  ;;  %v1788_v22 = vld [vmem:[%s2453_s28 + $0xd4] sm:$0xf] }
  0xe0   : > { %v784_v36 = vpop.f32.mrf.mxu0 }
  0xe1   : > { %v785_v38 = vadd.f32 %v2535_v61, %v784_v36  ;;  %v953_v39 = vpop.f32.mrf.mxu1  ;;  %v1032_v54 = vadd.f32 %v1031_v35, %v863_v40 }
  0xe3   : > { %v954_v41 = vadd.f32 %v953_v39, %v785_v38  ;;  %v1140_v1 = vmax.f32 %v1032_v54, 0.0 }
  0xe5   : > { %v1109_v49 = vmax.f32 %v954_v41, 0.0 }
  0xe6   : > { %v864_v52 = vpop.f32.mrf.mxu2 }
  0xe7   : > { %v1851_v55 = vpack.c.bf16 %v1109_v49, %v1108_v48  ;;  %v865_v56 = vadd.f32 %v2535_v61, %v864_v52  ;;  %v1033_v57 = vpop.f32.mrf.mxu3  ;;  %v1787_v48 = vld [vmem:[%s2453_s28 + $0xc4] sm:$0xf0]  ;;  %v1661_v49 = vld [vmem:[%s2453_s28 + $0x1c0] sm:$0xf]  ;;  %v1535_v52 = vld [vmem:[%s2453_s28 + $0xc8] sm:$0xf0] }
  0xe8   : > { %v787_v59 = vpop.f32.mrf.mxu0 }
  0xe9   : > { %2003 = vst [vmem:[%s2550_s20 + $0x8] sm:$0xff] %v1851_v55   ;;  %v1034_v63 = vadd.f32 %v1033_v57, %v865_v56  ;;  %v956_v0 = vpop.f32.mrf.mxu1  ;;  %v788_v4 = vadd.f32 %v2535_v61, %v787_v59  ;;  %v1818_v55 = vld [vmem:[%s2453_s28 + $0x1c4] sm:$0xf]  ;;  %v1663_v56 = vld [vmem:[%s2453_s28 + $0x1c8] sm:$0xf0] }
  0xeb   : > { %v1141_v2 = vmax.f32 %v1034_v63, 0.0  ;;  %826 = vmatmul.bf16.gmra.mxu0 %v1518_v53  ;;  %906 = vmatmul.bf16.gmra.mxu2 %v1646_v58  ;;  %v957_v8 = vadd.f32 %v956_v0, %v788_v4  ;;  %v1534_v58 = vor.u32 %v1787_v48, %v1533_v47  ;;  %v1662_v0 = vor.u32 %v1819_v50, %v1661_v49 }
  0xec   : > { %995 = vmatmul.bf16.gmra.mxu1 %v1522_v60  ;;  %1075 = vmatmul.bf16.gmra.mxu3 %v1650_v62 }
  0xed   : > { %v1931_v3 = vpack.c.bf16 %v1141_v2, %v1140_v1  ;;  %v1110_v19 = vmax.f32 %v957_v8, 0.0  ;;  %v1538_v2 = vor.u32 %v1786_v51, %v1535_v52  ;;  %v1549_v52 = vld [vmem:[%s2453_s28 + $0xe0] sm:$0xf] }
  0xee   : > { %v867_v5 = vpop.f32.mrf.mxu2 }
  0xef   : > { %2019 = vst [vmem:[%s2550_s20 + $0x88] sm:$0xff] %v1931_v3   ;;  %v1036_v6 = vpop.f32.mrf.mxu3  ;;  %v868_v11 = vadd.f32 %v2535_v61, %v867_v5  ;;  %v1666_v3 = vor.u32 %v1818_v55, %v1663_v56  ;;  %v1823_v55 = vld [vmem:[%s2453_s28 + $0x1e4] sm:$0xf0]  ;;  %v1790_v56 = vld [vmem:[%s2453_s28 + $0xe4] sm:$0xf] }
  0xf0   : > { %v789_v7 = vpop.f32.mrf.mxu0 }
  0xf1   : > { %v790_v9 = vadd.f32 %v2535_v61, %v789_v7  ;;  %v958_v10 = vpop.f32.mrf.mxu1  ;;  %v1037_v25 = vadd.f32 %v1036_v6, %v868_v11 }
  0xf3   : > { %v959_v12 = vadd.f32 %v958_v10, %v790_v9  ;;  %v1142_v35 = vmax.f32 %v1037_v25, 0.0 }
  0xf5   : > { %v1111_v20 = vmax.f32 %v959_v12, 0.0 }
  0xf6   : > { %v869_v23 = vpop.f32.mrf.mxu2 }
  0xf7   : > { %v1856_v26 = vpack.c.bf16 %v1111_v20, %v1110_v19  ;;  %v870_v27 = vadd.f32 %v2535_v61, %v869_v23  ;;  %v1038_v28 = vpop.f32.mrf.mxu3  ;;  %v1789_v19 = vld [vmem:[%s2453_s28 + $0xd4] sm:$0xf0]  ;;  %v1669_v20 = vld [vmem:[%s2453_s28 + $0x1d0] sm:$0xf]  ;;  %v1543_v23 = vld [vmem:[%s2453_s28 + $0xd8] sm:$0xf0] }
  0xf8   : > { %v792_v30 = vpop.f32.mrf.mxu0 }
  0xf9   : > { %2004 = vst [vmem:[%s2550_s20 + $0x10] sm:$0xff] %v1856_v26   ;;  %v1039_v33 = vadd.f32 %v1038_v28, %v870_v27  ;;  %v961_v34 = vpop.f32.mrf.mxu1  ;;  %v793_v38 = vadd.f32 %v2535_v61, %v792_v30  ;;  %v1820_v26 = vld [vmem:[%s2453_s28 + $0x1d4] sm:$0xf]  ;;  %v1671_v27 = vld [vmem:[%s2453_s28 + $0x1d8] sm:$0xf0] }
  0xfb   : > { %v1143_v36 = vmax.f32 %v1039_v33, 0.0  ;;  %831 = vmatmul.bf16.gmra.mxu0 %v1526_v24  ;;  %911 = vmatmul.bf16.gmra.mxu2 %v1654_v29  ;;  %v962_v42 = vadd.f32 %v961_v34, %v793_v38  ;;  %v1542_v29 = vor.u32 %v1789_v19, %v1541_v18  ;;  %v1670_v34 = vor.u32 %v1821_v21, %v1669_v20 }
  0xfc   : > { %1000 = vmatmul.bf16.gmra.mxu1 %v1530_v31  ;;  %1080 = vmatmul.bf16.gmra.mxu3 %v1658_v32 }
  0xfd   : > { %v1936_v37 = vpack.c.bf16 %v1143_v36, %v1142_v35  ;;  %v1112_v53 = vmax.f32 %v962_v42, 0.0  ;;  %v1546_v36 = vor.u32 %v1788_v22, %v1543_v23  ;;  %v1557_v23 = vld [vmem:[%s2453_s28 + $0xf0] sm:$0xf] }
  0xfe   : > { %v872_v39 = vpop.f32.mrf.mxu2 }
  0xff   : > { %2020 = vst [vmem:[%s2550_s20 + $0x90] sm:$0xff] %v1936_v37   ;;  %v1041_v40 = vpop.f32.mrf.mxu3  ;;  %v873_v45 = vadd.f32 %v2535_v61, %v872_v39  ;;  %v1674_v37 = vor.u32 %v1820_v26, %v1671_v27  ;;  %v1825_v26 = vld [vmem:[%s2453_s28 + $0x1f4] sm:$0xf0]  ;;  %v1792_v27 = vld [vmem:[%s2453_s28 + $0xf4] sm:$0xf] }
 0x100   : > { %v794_v41 = vpop.f32.mrf.mxu0 }
 0x101   : > { %v795_v43 = vadd.f32 %v2535_v61, %v794_v41  ;;  %v963_v44 = vpop.f32.mrf.mxu1  ;;  %v1042_v59 = vadd.f32 %v1041_v40, %v873_v45 }
 0x103   : > { %v964_v46 = vadd.f32 %v963_v44, %v795_v43  ;;  %v1144_v6 = vmax.f32 %v1042_v59, 0.0 }
 0x105   : > { %v1113_v54 = vmax.f32 %v964_v46, 0.0 }
 0x106   : > { %v874_v57 = vpop.f32.mrf.mxu2 }
 0x107   : > { %v1861_v60 = vpack.c.bf16 %v1113_v54, %v1112_v53  ;;  %v875_v62 = vadd.f32 %v2535_v61, %v874_v57  ;;  %v1043_v63 = vpop.f32.mrf.mxu3  ;;  %v1791_v53 = vld [vmem:[%s2453_s28 + $0xe4] sm:$0xf0]  ;;  %v1677_v54 = vld [vmem:[%s2453_s28 + $0x1e0] sm:$0xf]  ;;  %v1551_v57 = vld [vmem:[%s2453_s28 + $0xe8] sm:$0xf0] }
 0x108   : > { %v797_v1 = vpop.f32.mrf.mxu0 }
 0x109   : > { %2005 = vst [vmem:[%s2550_s20 + $0x18] sm:$0xff] %v1861_v60   ;;  %v1044_v4 = vadd.f32 %v1043_v63, %v875_v62  ;;  %v966_v5 = vpop.f32.mrf.mxu1  ;;  %v798_v9 = vadd.f32 %v2535_v61, %v797_v1  ;;  %v1822_v60 = vld [vmem:[%s2453_s28 + $0x1e4] sm:$0xf]  ;;  %v1679_v62 = vld [vmem:[%s2453_s28 + $0x1e8] sm:$0xf0] }
 0x10b   : > { %v1145_v7 = vmax.f32 %v1044_v4, 0.0  ;;  %836 = vmatmul.bf16.gmra.mxu0 %v1534_v58  ;;  %916 = vmatmul.bf16.gmra.mxu2 %v1662_v0  ;;  %v967_v13 = vadd.f32 %v966_v5, %v798_v9  ;;  %v1550_v0 = vor.u32 %v1791_v53, %v1549_v52  ;;  %v1678_v5 = vor.u32 %v1823_v55, %v1677_v54 }
 0x10c   : > { %1005 = vmatmul.bf16.gmra.mxu1 %v1538_v2  ;;  %1085 = vmatmul.bf16.gmra.mxu3 %v1666_v3 }
 0x10d   : > { %v1941_v8 = vpack.c.bf16 %v1145_v7, %v1144_v6  ;;  %v1114_v24 = vmax.f32 %v967_v13, 0.0  ;;  %v1554_v7 = vor.u32 %v1790_v56, %v1551_v57 }
 0x10e   : > { %v877_v10 = vpop.f32.mrf.mxu2 }
 0x10f   : > { %2021 = vst [vmem:[%s2550_s20 + $0x98] sm:$0xff] %v1941_v8   ;;  %v1046_v11 = vpop.f32.mrf.mxu3  ;;  %v878_v16 = vadd.f32 %v2535_v61, %v877_v10  ;;  %v1682_v8 = vor.u32 %v1822_v60, %v1679_v62 }
 0x110   : > { %v799_v12 = vpop.f32.mrf.mxu0 }
 0x111   : > { %v800_v14 = vadd.f32 %v2535_v61, %v799_v12  ;;  %v968_v15 = vpop.f32.mrf.mxu1  ;;  %v1047_v30 = vadd.f32 %v1046_v11, %v878_v16 }
 0x113   : > { %v969_v17 = vadd.f32 %v968_v15, %v800_v14  ;;  %v1146_v40 = vmax.f32 %v1047_v30, 0.0 }
 0x115   : > { %v1115_v25 = vmax.f32 %v969_v17, 0.0 }
 0x116   : > { %v879_v28 = vpop.f32.mrf.mxu2 }
 0x117   : > { %v1866_v31 = vpack.c.bf16 %v1115_v25, %v1114_v24  ;;  %v880_v32 = vadd.f32 %v2535_v61, %v879_v28  ;;  %v1048_v33 = vpop.f32.mrf.mxu3  ;;  %v1793_v24 = vld [vmem:[%s2453_s28 + $0xf4] sm:$0xf0]  ;;  %v1685_v25 = vld [vmem:[%s2453_s28 + $0x1f0] sm:$0xf]  ;;  %v1559_v28 = vld [vmem:[%s2453_s28 + $0xf8] sm:$0xf0] }
 0x118   : > { %v802_v35 = vpop.f32.mrf.mxu0 }
 0x119   : > { %2006 = vst [vmem:[%s2550_s20 + $0x20] sm:$0xff] %v1866_v31   ;;  %v1049_v38 = vadd.f32 %v1048_v33, %v880_v32  ;;  %v971_v39 = vpop.f32.mrf.mxu1  ;;  %v803_v43 = vadd.f32 %v2535_v61, %v802_v35  ;;  %v1824_v31 = vld [vmem:[%s2453_s28 + $0x1f4] sm:$0xf]  ;;  %v1687_v32 = vld [vmem:[%s2453_s28 + $0x1f8] sm:$0xf0] }
 0x11b   : > { %v1147_v41 = vmax.f32 %v1049_v38, 0.0  ;;  %841 = vmatmul.bf16.gmra.mxu0 %v1542_v29  ;;  %921 = vmatmul.bf16.gmra.mxu2 %v1670_v34  ;;  %v972_v47 = vadd.f32 %v971_v39, %v803_v43  ;;  %v1558_v34 = vor.u32 %v1793_v24, %v1557_v23  ;;  %v1686_v39 = vor.u32 %v1825_v26, %v1685_v25 }
 0x11c   : > { %1010 = vmatmul.bf16.gmra.mxu1 %v1546_v36  ;;  %1090 = vmatmul.bf16.gmra.mxu3 %v1674_v37 }
 0x11d   : > { %v1946_v42 = vpack.c.bf16 %v1147_v41, %v1146_v40  ;;  %v1116_v58 = vmax.f32 %v972_v47, 0.0  ;;  %v1562_v41 = vor.u32 %v1792_v27, %v1559_v28 }
 0x11e   : > { %v882_v44 = vpop.f32.mrf.mxu2 }
 0x11f   : > { %2022 = vst [vmem:[%s2550_s20 + $0xa0] sm:$0xff] %v1946_v42   ;;  %v1051_v45 = vpop.f32.mrf.mxu3  ;;  %v883_v50 = vadd.f32 %v2535_v61, %v882_v44  ;;  %v1690_v42 = vor.u32 %v1824_v31, %v1687_v32 }
 0x120   : > { %v804_v46 = vpop.f32.mrf.mxu0 }
 0x121   : > { %v805_v48 = vadd.f32 %v2535_v61, %v804_v46  ;;  %v973_v49 = vpop.f32.mrf.mxu1  ;;  %v1052_v1 = vadd.f32 %v1051_v45, %v883_v50 }
 0x123   : > { %v974_v51 = vadd.f32 %v973_v49, %v805_v48  ;;  %v1148_v11 = vmax.f32 %v1052_v1, 0.0 }
 0x125   : > { %v1117_v59 = vmax.f32 %v974_v51, 0.0 }
 0x126   : > { %v884_v63 = vpop.f32.mrf.mxu2 }
 0x127   : > { %v1871_v2 = vpack.c.bf16 %v1117_v59, %v1116_v58  ;;  %v885_v3 = vadd.f32 %v2535_v61, %v884_v63  ;;  %v1053_v4 = vpop.f32.mrf.mxu3 }
 0x128   : > { %v807_v6 = vpop.f32.mrf.mxu0 }
 0x129   : > { %2007 = vst [vmem:[%s2550_s20 + $0x28] sm:$0xff] %v1871_v2   ;;  %v1054_v9 = vadd.f32 %v1053_v4, %v885_v3  ;;  %v976_v10 = vpop.f32.mrf.mxu1  ;;  %v808_v14 = vadd.f32 %v2535_v61, %v807_v6 }
 0x12b   : > { %v1149_v12 = vmax.f32 %v1054_v9, 0.0  ;;  %846 = vmatmul.bf16.gmra.mxu0 %v1550_v0  ;;  %926 = vmatmul.bf16.gmra.mxu2 %v1678_v5  ;;  %v977_v18 = vadd.f32 %v976_v10, %v808_v14 }
 0x12c   : > { %1015 = vmatmul.bf16.gmra.mxu1 %v1554_v7  ;;  %1095 = vmatmul.bf16.gmra.mxu3 %v1682_v8 }
 0x12d   : > { %v1951_v13 = vpack.c.bf16 %v1149_v12, %v1148_v11  ;;  %v1118_v29 = vmax.f32 %v977_v18, 0.0 }
 0x12e   : > { %v887_v15 = vpop.f32.mrf.mxu2 }
 0x12f   : > { %2023 = vst [vmem:[%s2550_s20 + $0xa8] sm:$0xff] %v1951_v13   ;;  %v1056_v16 = vpop.f32.mrf.mxu3  ;;  %v888_v21 = vadd.f32 %v2535_v61, %v887_v15 }
 0x130   : > { %v809_v17 = vpop.f32.mrf.mxu0 }
 0x131   : > { %v810_v19 = vadd.f32 %v2535_v61, %v809_v17  ;;  %v978_v20 = vpop.f32.mrf.mxu1  ;;  %v1057_v35 = vadd.f32 %v1056_v16, %v888_v21 }
 0x133   : > { %v979_v22 = vadd.f32 %v978_v20, %v810_v19  ;;  %v1150_v45 = vmax.f32 %v1057_v35, 0.0 }
 0x135   : > { %v1119_v30 = vmax.f32 %v979_v22, 0.0 }
 0x136   : > { %v889_v33 = vpop.f32.mrf.mxu2 }
 0x137   : > { %v1876_v36 = vpack.c.bf16 %v1119_v30, %v1118_v29  ;;  %v890_v37 = vadd.f32 %v2535_v61, %v889_v33  ;;  %v1058_v38 = vpop.f32.mrf.mxu3 }
 0x138   : > { %v812_v40 = vpop.f32.mrf.mxu0 }
 0x139   : > { %2008 = vst [vmem:[%s2550_s20 + $0x30] sm:$0xff] %v1876_v36   ;;  %v1059_v43 = vadd.f32 %v1058_v38, %v890_v37  ;;  %v981_v44 = vpop.f32.mrf.mxu1  ;;  %v813_v48 = vadd.f32 %v2535_v61, %v812_v40 }
 0x13b   : > { %v1151_v46 = vmax.f32 %v1059_v43, 0.0  ;;  %851 = vmatmul.bf16.gmra.mxu0 %v1558_v34  ;;  %931 = vmatmul.bf16.gmra.mxu2 %v1686_v39  ;;  %v982_v52 = vadd.f32 %v981_v44, %v813_v48 }
 0x13c   : > { %1020 = vmatmul.bf16.gmra.mxu1 %v1562_v41  ;;  %1100 = vmatmul.bf16.gmra.mxu3 %v1690_v42 }
 0x13d   : > { %v1956_v47 = vpack.c.bf16 %v1151_v46, %v1150_v45  ;;  %v1120_v57 = vmax.f32 %v982_v52, 0.0 }
 0x13e   : > { %v892_v49 = vpop.f32.mrf.mxu2 }
 0x13f   : > { %2024 = vst [vmem:[%s2550_s20 + $0xb0] sm:$0xff] %v1956_v47   ;;  %v1061_v50 = vpop.f32.mrf.mxu3  ;;  %v893_v55 = vadd.f32 %v2535_v61, %v892_v49 }
 0x140   : > { %v814_v51 = vpop.f32.mrf.mxu0 }
 0x141   : > { %v815_v53 = vadd.f32 %v2535_v61, %v814_v51  ;;  %v983_v54 = vpop.f32.mrf.mxu1  ;;  %v1062_v60 = vadd.f32 %v1061_v50, %v893_v55 }
 0x143   : > { %v984_v56 = vadd.f32 %v983_v54, %v815_v53  ;;  %v1152_v4 = vmax.f32 %v1062_v60, 0.0 }
 0x145   : > { %v1121_v58 = vmax.f32 %v984_v56, 0.0 }
 0x146   : > { %v894_v59 = vpop.f32.mrf.mxu2 }
 0x147   : > { %v1881_v62 = vpack.c.bf16 %v1121_v58, %v1120_v57  ;;  %v895_v63 = vadd.f32 %v2535_v61, %v894_v59  ;;  %v1063_v0 = vpop.f32.mrf.mxu3 }
 0x148   : > { %v817_v1 = vpop.f32.mrf.mxu0 }
 0x149   : > { %2009 = vst [vmem:[%s2550_s20 + $0x38] sm:$0xff] %v1881_v62   ;;  %v1064_v2 = vadd.f32 %v1063_v0, %v895_v63  ;;  %v986_v3 = vpop.f32.mrf.mxu1  ;;  %v818_v7 = vadd.f32 %v2535_v61, %v817_v1 }
 0x14b   : > { %v1153_v5 = vmax.f32 %v1064_v2, 0.0  ;;  %v987_v11 = vadd.f32 %v986_v3, %v818_v7 }
 0x14d   : > { %v1961_v6 = vpack.c.bf16 %v1153_v5, %v1152_v4  ;;  %v1122_v16 = vmax.f32 %v987_v11, 0.0 }
 0x14e   : > { %v897_v8 = vpop.f32.mrf.mxu2 }
 0x14f   : > { %2025 = vst [vmem:[%s2550_s20 + $0xb8] sm:$0xff] %v1961_v6   ;;  %v1066_v9 = vpop.f32.mrf.mxu3  ;;  %v898_v14 = vadd.f32 %v2535_v61, %v897_v8 }
 0x150   : > { %v819_v10 = vpop.f32.mrf.mxu0 }
 0x151   : > { %v820_v12 = vadd.f32 %v2535_v61, %v819_v10  ;;  %v988_v13 = vpop.f32.mrf.mxu1  ;;  %v1067_v19 = vadd.f32 %v1066_v9, %v898_v14 }
 0x153   : > { %v989_v15 = vadd.f32 %v988_v13, %v820_v12  ;;  %v1154_v26 = vmax.f32 %v1067_v19, 0.0 }
 0x155   : > { %v1123_v17 = vmax.f32 %v989_v15, 0.0 }
 0x156   : > { %v899_v18 = vpop.f32.mrf.mxu2 }
 0x157   : > { %v1886_v20 = vpack.c.bf16 %v1123_v17, %v1122_v16  ;;  %v900_v21 = vadd.f32 %v2535_v61, %v899_v18  ;;  %v1068_v22 = vpop.f32.mrf.mxu3 }
 0x158   : > { %v822_v23 = vpop.f32.mrf.mxu0 }
 0x159   : > { %2010 = vst [vmem:[%s2550_s20 + $0x40] sm:$0xff] %v1886_v20   ;;  %v1069_v24 = vadd.f32 %v1068_v22, %v900_v21  ;;  %v991_v25 = vpop.f32.mrf.mxu1  ;;  %v823_v29 = vadd.f32 %v2535_v61, %v822_v23 }
 0x15b   : > { %v1155_v27 = vmax.f32 %v1069_v24, 0.0  ;;  %v992_v33 = vadd.f32 %v991_v25, %v823_v29 }
 0x15d   : > { %v1966_v28 = vpack.c.bf16 %v1155_v27, %v1154_v26  ;;  %v1124_v38 = vmax.f32 %v992_v33, 0.0 }
 0x15e   : > { %v902_v30 = vpop.f32.mrf.mxu2 }
 0x15f   : > { %2026 = vst [vmem:[%s2550_s20 + $0xc0] sm:$0xff] %v1966_v28   ;;  %v1071_v31 = vpop.f32.mrf.mxu3  ;;  %v903_v36 = vadd.f32 %v2535_v61, %v902_v30 }
 0x160   : > { %v824_v32 = vpop.f32.mrf.mxu0 }
 0x161   : > { %v825_v34 = vadd.f32 %v2535_v61, %v824_v32  ;;  %v993_v35 = vpop.f32.mrf.mxu1  ;;  %v1072_v41 = vadd.f32 %v1071_v31, %v903_v36 }
 0x163   : > { %v994_v37 = vadd.f32 %v993_v35, %v825_v34  ;;  %v1156_v48 = vmax.f32 %v1072_v41, 0.0 }
 0x165   : > { %v1125_v39 = vmax.f32 %v994_v37, 0.0 }
 0x166   : > { %v904_v40 = vpop.f32.mrf.mxu2 }
 0x167   : > { %v1891_v42 = vpack.c.bf16 %v1125_v39, %v1124_v38  ;;  %v905_v43 = vadd.f32 %v2535_v61, %v904_v40  ;;  %v1073_v44 = vpop.f32.mrf.mxu3 }
 0x168   : > { %v827_v45 = vpop.f32.mrf.mxu0 }
 0x169   : > { %2011 = vst [vmem:[%s2550_s20 + $0x48] sm:$0xff] %v1891_v42   ;;  %v1074_v46 = vadd.f32 %v1073_v44, %v905_v43  ;;  %v996_v47 = vpop.f32.mrf.mxu1  ;;  %v828_v51 = vadd.f32 %v2535_v61, %v827_v45 }
 0x16b   : > { %v1157_v49 = vmax.f32 %v1074_v46, 0.0  ;;  %v997_v55 = vadd.f32 %v996_v47, %v828_v51 }
 0x16d   : > { %v1971_v50 = vpack.c.bf16 %v1157_v49, %v1156_v48  ;;  %v1126_v60 = vmax.f32 %v997_v55, 0.0 }
 0x16e   : > { %v907_v52 = vpop.f32.mrf.mxu2 }
 0x16f   : > { %2027 = vst [vmem:[%s2550_s20 + $0xc8] sm:$0xff] %v1971_v50   ;;  %v1076_v53 = vpop.f32.mrf.mxu3  ;;  %v908_v58 = vadd.f32 %v2535_v61, %v907_v52 }
 0x170   : > { %v829_v54 = vpop.f32.mrf.mxu0 }
 0x171   : > { %v830_v56 = vadd.f32 %v2535_v61, %v829_v54  ;;  %v998_v57 = vpop.f32.mrf.mxu1  ;;  %v1077_v0 = vadd.f32 %v1076_v53, %v908_v58 }
 0x173   : > { %v999_v59 = vadd.f32 %v998_v57, %v830_v56  ;;  %v1158_v7 = vmax.f32 %v1077_v0, 0.0 }
 0x175   : > { %v1127_v62 = vmax.f32 %v999_v59, 0.0 }
 0x176   : > { %v909_v63 = vpop.f32.mrf.mxu2 }
 0x177   : > { %v1896_v1 = vpack.c.bf16 %v1127_v62, %v1126_v60  ;;  %v910_v2 = vadd.f32 %v2535_v61, %v909_v63  ;;  %v1078_v3 = vpop.f32.mrf.mxu3 }
 0x178   : > { %v832_v4 = vpop.f32.mrf.mxu0 }
 0x179   : > { %2012 = vst [vmem:[%s2550_s20 + $0x50] sm:$0xff] %v1896_v1   ;;  %v1079_v5 = vadd.f32 %v1078_v3, %v910_v2  ;;  %v1001_v6 = vpop.f32.mrf.mxu1  ;;  %v833_v10 = vadd.f32 %v2535_v61, %v832_v4 }
 0x17b   : > { %v1159_v8 = vmax.f32 %v1079_v5, 0.0  ;;  %v1002_v14 = vadd.f32 %v1001_v6, %v833_v10 }
 0x17d   : > { %v1976_v9 = vpack.c.bf16 %v1159_v8, %v1158_v7  ;;  %v1128_v19 = vmax.f32 %v1002_v14, 0.0 }
 0x17e   : > { %v912_v11 = vpop.f32.mrf.mxu2 }
 0x17f   : > { %2028 = vst [vmem:[%s2550_s20 + $0xd0] sm:$0xff] %v1976_v9   ;;  %v1081_v12 = vpop.f32.mrf.mxu3  ;;  %v913_v17 = vadd.f32 %v2535_v61, %v912_v11 }
 0x180   : > { %v834_v13 = vpop.f32.mrf.mxu0 }
 0x181   : > { %v835_v15 = vadd.f32 %v2535_v61, %v834_v13  ;;  %v1003_v16 = vpop.f32.mrf.mxu1  ;;  %v1082_v22 = vadd.f32 %v1081_v12, %v913_v17 }
 0x183   : > { %v1004_v18 = vadd.f32 %v1003_v16, %v835_v15  ;;  %v1160_v29 = vmax.f32 %v1082_v22, 0.0 }
 0x185   : > { %v1129_v20 = vmax.f32 %v1004_v18, 0.0 }
 0x186   : > { %v914_v21 = vpop.f32.mrf.mxu2 }
 0x187   : > { %v1901_v23 = vpack.c.bf16 %v1129_v20, %v1128_v19  ;;  %v915_v24 = vadd.f32 %v2535_v61, %v914_v21  ;;  %v1083_v25 = vpop.f32.mrf.mxu3 }
 0x188   : > { %v837_v26 = vpop.f32.mrf.mxu0 }
 0x189   : > { %2013 = vst [vmem:[%s2550_s20 + $0x58] sm:$0xff] %v1901_v23   ;;  %v1084_v27 = vadd.f32 %v1083_v25, %v915_v24  ;;  %v1006_v28 = vpop.f32.mrf.mxu1  ;;  %v838_v32 = vadd.f32 %v2535_v61, %v837_v26 }
 0x18b   : > { %v1161_v30 = vmax.f32 %v1084_v27, 0.0  ;;  %v1007_v36 = vadd.f32 %v1006_v28, %v838_v32 }
 0x18d   : > { %v1981_v31 = vpack.c.bf16 %v1161_v30, %v1160_v29  ;;  %v1130_v41 = vmax.f32 %v1007_v36, 0.0 }
 0x18e   : > { %v917_v33 = vpop.f32.mrf.mxu2 }
 0x18f   : > { %2029 = vst [vmem:[%s2550_s20 + $0xd8] sm:$0xff] %v1981_v31   ;;  %v1086_v34 = vpop.f32.mrf.mxu3  ;;  %v918_v39 = vadd.f32 %v2535_v61, %v917_v33 }
 0x190   : > { %v839_v35 = vpop.f32.mrf.mxu0 }
 0x191   : > { %v840_v37 = vadd.f32 %v2535_v61, %v839_v35  ;;  %v1008_v38 = vpop.f32.mrf.mxu1  ;;  %v1087_v44 = vadd.f32 %v1086_v34, %v918_v39 }
 0x193   : > { %v1009_v40 = vadd.f32 %v1008_v38, %v840_v37  ;;  %v1162_v51 = vmax.f32 %v1087_v44, 0.0 }
 0x195   : > { %v1131_v42 = vmax.f32 %v1009_v40, 0.0 }
 0x196   : > { %v919_v43 = vpop.f32.mrf.mxu2 }
 0x197   : > { %v1906_v45 = vpack.c.bf16 %v1131_v42, %v1130_v41  ;;  %v920_v46 = vadd.f32 %v2535_v61, %v919_v43  ;;  %v1088_v47 = vpop.f32.mrf.mxu3 }
 0x198   : > { %v842_v48 = vpop.f32.mrf.mxu0 }
 0x199   : > { %2014 = vst [vmem:[%s2550_s20 + $0x60] sm:$0xff] %v1906_v45   ;;  %v1089_v49 = vadd.f32 %v1088_v47, %v920_v46  ;;  %v1011_v50 = vpop.f32.mrf.mxu1  ;;  %v843_v54 = vadd.f32 %v2535_v61, %v842_v48 }
 0x19b   : > { %v1163_v52 = vmax.f32 %v1089_v49, 0.0  ;;  %v1012_v58 = vadd.f32 %v1011_v50, %v843_v54 }
 0x19d   : > { %v1986_v53 = vpack.c.bf16 %v1163_v52, %v1162_v51  ;;  %v1132_v0 = vmax.f32 %v1012_v58, 0.0 }
 0x19e   : > { %v922_v55 = vpop.f32.mrf.mxu2 }
 0x19f   : > { %2030 = vst [vmem:[%s2550_s20 + $0xe0] sm:$0xff] %v1986_v53   ;;  %v1091_v56 = vpop.f32.mrf.mxu3  ;;  %v923_v62 = vadd.f32 %v2535_v61, %v922_v55 }
 0x1a0   : > { %v844_v57 = vpop.f32.mrf.mxu0 }
 0x1a1   : > { %v845_v59 = vadd.f32 %v2535_v61, %v844_v57  ;;  %v1013_v60 = vpop.f32.mrf.mxu1  ;;  %v1092_v3 = vadd.f32 %v1091_v56, %v923_v62 }
 0x1a3   : > { %v1014_v63 = vadd.f32 %v1013_v60, %v845_v59  ;;  %v1164_v10 = vmax.f32 %v1092_v3, 0.0 }
 0x1a5   : > { %v1133_v1 = vmax.f32 %v1014_v63, 0.0 }
 0x1a6   : > { %v924_v2 = vpop.f32.mrf.mxu2 }
 0x1a7   : > { %v1911_v4 = vpack.c.bf16 %v1133_v1, %v1132_v0  ;;  %v925_v5 = vadd.f32 %v2535_v61, %v924_v2  ;;  %v1093_v6 = vpop.f32.mrf.mxu3 }
 0x1a8   : > { %v847_v7 = vpop.f32.mrf.mxu0 }
 0x1a9   : > { %2015 = vst [vmem:[%s2550_s20 + $0x68] sm:$0xff] %v1911_v4   ;;  %v1094_v8 = vadd.f32 %v1093_v6, %v925_v5  ;;  %v1016_v9 = vpop.f32.mrf.mxu1  ;;  %v848_v13 = vadd.f32 %v2535_v61, %v847_v7 }
 0x1ab   : > { %v1165_v11 = vmax.f32 %v1094_v8, 0.0  ;;  %v1017_v17 = vadd.f32 %v1016_v9, %v848_v13 }
 0x1ad   : > { %v1991_v12 = vpack.c.bf16 %v1165_v11, %v1164_v10  ;;  %v1134_v22 = vmax.f32 %v1017_v17, 0.0 }
 0x1ae   : > { %v927_v14 = vpop.f32.mrf.mxu2 }
 0x1af   : > { %2031 = vst [vmem:[%s2550_s20 + $0xe8] sm:$0xff] %v1991_v12   ;;  %v1096_v15 = vpop.f32.mrf.mxu3  ;;  %v928_v20 = vadd.f32 %v2535_v61, %v927_v14 }
 0x1b0   : > { %v849_v16 = vpop.f32.mrf.mxu0 }
 0x1b1   : > { %v850_v18 = vadd.f32 %v2535_v61, %v849_v16  ;;  %v1018_v19 = vpop.f32.mrf.mxu1  ;;  %v1097_v25 = vadd.f32 %v1096_v15, %v928_v20 }
 0x1b3   : > { %v1019_v21 = vadd.f32 %v1018_v19, %v850_v18  ;;  %v1166_v32 = vmax.f32 %v1097_v25, 0.0 }
 0x1b5   : > { %v1135_v23 = vmax.f32 %v1019_v21, 0.0 }
 0x1b6   : > { %v929_v24 = vpop.f32.mrf.mxu2 }
 0x1b7   : > { %v1916_v26 = vpack.c.bf16 %v1135_v23, %v1134_v22  ;;  %v930_v27 = vadd.f32 %v2535_v61, %v929_v24  ;;  %v1098_v28 = vpop.f32.mrf.mxu3 }
 0x1b8   : > { %v852_v29 = vpop.f32.mrf.mxu0 }
 0x1b9   : > { %2016 = vst [vmem:[%s2550_s20 + $0x70] sm:$0xff] %v1916_v26   ;;  %v1099_v30 = vadd.f32 %v1098_v28, %v930_v27  ;;  %v1021_v31 = vpop.f32.mrf.mxu1  ;;  %v853_v35 = vadd.f32 %v2535_v61, %v852_v29 }
 0x1bb   : > { %v1167_v33 = vmax.f32 %v1099_v30, 0.0  ;;  %v1022_v39 = vadd.f32 %v1021_v31, %v853_v35 }
 0x1bd   : > { %v1996_v34 = vpack.c.bf16 %v1167_v33, %v1166_v32  ;;  %v1136_v44 = vmax.f32 %v1022_v39, 0.0 }
 0x1be   : > { %v932_v36 = vpop.f32.mrf.mxu2 }
 0x1bf   : > { %2032 = vst [vmem:[%s2550_s20 + $0xf0] sm:$0xff] %v1996_v34   ;;  %v1101_v37 = vpop.f32.mrf.mxu3  ;;  %v933_v42 = vadd.f32 %v2535_v61, %v932_v36 }
 0x1c0   : > { %v854_v38 = vpop.f32.mrf.mxu0 }
 0x1c1   : > { %v855_v40 = vadd.f32 %v2535_v61, %v854_v38  ;;  %v1023_v41 = vpop.f32.mrf.mxu1  ;;  %v1102_v47 = vadd.f32 %v1101_v37, %v933_v42 }
 0x1c3   : > { %v1024_v43 = vadd.f32 %v1023_v41, %v855_v40  ;;  %v1168_v52 = vmax.f32 %v1102_v47, 0.0 }
 0x1c5   : > { %v1137_v45 = vmax.f32 %v1024_v43, 0.0 }
 0x1c6   : > { %v934_v46 = vpop.f32.mrf.mxu2 }
 0x1c7   : > { %v1921_v48 = vpack.c.bf16 %v1137_v45, %v1136_v44  ;;  %v935_v49 = vadd.f32 %v2535_v61, %v934_v46  ;;  %v1103_v50 = vpop.f32.mrf.mxu3 }
 0x1c9   : > { %2017 = vst [vmem:[%s2550_s20 + $0x78] sm:$0xff] %v1921_v48   ;;  %v1104_v51 = vadd.f32 %v1103_v50, %v935_v49 }
 0x1cb   : > { %v1169_v53 = vmax.f32 %v1104_v51, 0.0 }
 0x1cd   : > { %v2001_v54 = vpack.c.bf16 %v1169_v53, %v1168_v52 }
 0x1cf   : > { %2033 = vst [vmem:[%s2550_s20 + $0xf8] sm:$0xff] %v2001_v54  }
 0x1d0   : > { %2257 = shalt.err (!%p2254_p12)
}
 0x1d1   : > { %s2324_s11 = smov 64   ;;  %s2325_s26 = smov 4  }
 0x1d2   : > { %2060 = dma.vmem_to_hbm [thread:$0]  (%p2428_p5), %s1313_s30, 4096, %s1315_s4, %s1299_s15, %s2324_s11, %s2324_s11, %s2325_s26  }
 0x1d3 PF: > { %p2082_p13 = scmp.ge.s32.totalorder %s2316_s17, 2  ;;  %s1329_s28 = sand.u32 1, %s2296_s12  }
 0x1d4   : > { %s1330_s1 = scalar_lea.sflag [#allocation4], %s1329_s28 }
 0x1d5   : > { %p2074_p0 = pnand %p2082_p13, %p2395_p6 }
 0x1d7   : > { %p2075_p3 = pneg %p2074_p0 }
 0x1d9   : > { %2291 = dma.done.wait (%p2075_p3), %s1330_s1, 4096  }
 0x1da   : > { %2293 = vsyncadd (%p2075_p3), %s1330_s1, 4294963200  ;;  %s20_s17 = sadd.s32 1, %s2316_s17   ;;  %s2743_s12 = smov %s2300_s13 }
 0x1db   : > { %p17_p7 = scmp.ge.s32.totalorder %s20_s17, 8   ;;  %s2744_s13 = smov %s2304_s14 }
 0x1dc   : > { %s2745_s14 = smov %s2437_s29  ;;  %s2746_s15 = smov %s2312_s16 }
 0x1dd   : > { %s2747_s16 = smov %s2749_s10  ;;  %19 = sbr.rel (!%p17_p7) target bundleno = 9 (0x9), region = 87 }
 0x1e2   :  { %1336 = vsyncpa [#allocation3], 1 }
 0x1e3   :  { %1338 = vsyncpa [#allocation3 + $0x1], 1 }
 0x1e4   :  { %1339 = vsyncpa [#allocation6], 1 }
 0x1e5   :  { %1340 = vsyncpa [#allocation4], 1 }
 0x1e6   :  { %1342 = vsyncpa [#allocation4 + $0x1], 1 }

</bundles_post_ra>
